<compile_context>
chip_gen: v5e
topology: v5e:2x2
jax: 0.10.0
libtpu: 0.0.40
codegen_flags: <defaults>
</compile_context>

<pallas_src>
import functools
import math

import jax
import jax.numpy as jnp
import numpy as np
from jax import lax
from jax.experimental import pallas as pl
from jax.experimental.pallas import tpu as pltpu

LANE = 128


def _block_kernel(x_ref, wdw_ref, b1_ref, wpw_ref, b2_ref, o_ref, *,
                  stride, th, w_out):
    """One (batch element, output-row tile) per grid step.

    x_ref:   (1, s*s, Hc, Wc, Cp)  zero-padded, channel-padded input,
                                   de-interleaved by (row, col) parity
    wdw_ref: (3, 3, Cp)            depthwise weights (BN1 scale folded in)
    b1_ref:  (1, Cp)               BN1 bias
    wpw_ref: (Cp, Cop) bf16        pointwise weights (BN2 scale folded in)
    b2_ref:  (1, Cop)              BN2 bias
    o_ref:   (1, th, w_out, Cop)   lane-dense (Cop multiple of 128)
    """
    r = pl.program_id(1)                       # output-row tile index
    cp = wdw_ref.shape[-1]
    cop = wpw_ref.shape[-1]

    wdw = wdw_ref[...]                         # (3, 3, Cp)

    # ---- depthwise 3x3 conv (groups == Cin); all loads contiguous ----------
    acc = jnp.zeros((th, w_out, cp), jnp.float32)
    for kh in range(3):
        for kw in range(3):
            pidx = (kh % stride) * stride + (kw % stride)
            slab = x_ref[0, pidx,
                         pl.ds(r * th + kh // stride, th),
                         pl.ds(kw // stride, w_out), :]
            acc = acc + slab * wdw[kh, kw][None, None, :]

    # ---- BN1 bias + ReLU (VPU, f32) ----------------------------------------
    h1 = jnp.maximum(acc + b1_ref[0][None, None, :], 0.0)

    # ---- pointwise 1x1 conv == channel matmul (MXU, bf16 in / f32 acc) -----
    h1_2d = h1.reshape(th * w_out, cp).astype(jnp.bfloat16)
    y = jnp.dot(h1_2d, wpw_ref[...], preferred_element_type=jnp.float32)

    # ---- BN2 bias + ReLU, lane-dense store ----------------------------------
    y = jnp.maximum(y + b2_ref[0][None, :], 0.0)
    o_ref[0] = y.reshape(th, w_out, cop)


def mobile_block_forward(x_nhwc, w_dw, bn1, w_pw, bn2, *, stride=1, eps=1e-5):
    """x_nhwc: (N, H, W, Cin) float32.  Returns (N, Hout, Wout, Cout) float32."""
    n, h, w, cin = x_nhwc.shape
    cout = w_pw.shape[1]
    s = stride
    h_out = (h + 2 - 3) // s + 1
    w_out = (w + 2 - 3) // s + 1

    # channel padding to lane width (makes MXU K/N and output stores dense)
    cp = ((cin + LANE - 1) // LANE) * LANE
    cop = ((cout + LANE - 1) // LANE) * LANE

    # ---- fold BN (inference form) into weights / biases (wrapper, O(Cin*Cout))
    g1, be1, m1, v1 = bn1
    s1 = g1 / jnp.sqrt(v1 + eps)
    o1 = be1 - m1 * s1
    g2, be2, m2, v2 = bn2
    s2 = g2 / jnp.sqrt(v2 + eps)
    o2 = be2 - m2 * s2

    wdw_f = w_dw * s1[None, None, :]           # (3, 3, Cin)
    wpw_f = w_pw * s2[None, :]                 # (Cin, Cout)

    wdw_p = jnp.zeros((3, 3, cp), jnp.float32).at[:, :, :cin].set(wdw_f)
    b1_p = jnp.zeros((1, cp), jnp.float32).at[0, :cin].set(o1)
    wpw_p = (jnp.zeros((cp, cop), jnp.float32)
             .at[:cin, :cout].set(wpw_f).astype(jnp.bfloat16))
    b2_p = jnp.zeros((1, cop), jnp.float32).at[0, :cout].set(o2)

    # ---- spatial pad (padding=1), channel pad, de-interleave by stride ------
    hp, wp_ = h + 2, w + 2
    hc = -(-hp // s)                           # ceil(hp / s)
    wc = -(-wp_ // s)
    xp = jnp.zeros((n, s * hc, s * wc, cp), jnp.float32)
    xp = xp.at[:, 1:1 + h, 1:1 + w, :cin].set(x_nhwc)
    # [b, i, ph, j, pw, c] -> parity-major layout [b, ph*s+pw, i, j, c]
    x_arr = (xp.reshape(n, hc, s, wc, s, cp)
               .transpose(0, 2, 4, 1, 3, 5)
               .reshape(n, s * s, hc, wc, cp))

    # ---- output-row tiling ---------------------------------------------------
    th = h_out if h_out <= 8 else math.gcd(h_out, 8)
    n_row_tiles = h_out // th
    # TODO(synk): for very large images, replace the resident full-image input
    # block with a true haloed row-tile fetched via manual DMA (pl.ANY).

    kern = functools.partial(_block_kernel, stride=s, th=th, w_out=w_out)

    out_p = pl.pallas_call(
        kern,
        out_shape=jax.ShapeDtypeStruct((n, h_out, w_out, cop), jnp.float32),
        grid_spec=pltpu.PrefetchScalarGridSpec(
            num_scalar_prefetch=0,
            grid=(n, n_row_tiles),
            in_specs=[
                pl.BlockSpec((1, s * s, hc, wc, cp),
                             lambda b, r: (b, 0, 0, 0, 0)),
                pl.BlockSpec((3, 3, cp), lambda b, r: (0, 0, 0)),
                pl.BlockSpec((1, cp), lambda b, r: (0, 0)),
                pl.BlockSpec((cp, cop), lambda b, r: (0, 0)),
                pl.BlockSpec((1, cop), lambda b, r: (0, 0)),
            ],
            out_specs=pl.BlockSpec((1, th, w_out, cop),
                                   lambda b, r: (b, r, 0, 0)),
        ),
        compiler_params=pltpu.CompilerParams(
            dimension_semantics=("parallel", "parallel"),
            vmem_limit_bytes=32 * 1024 * 1024),
    )(x_arr, wdw_p, b1_p, wpw_p, b2_p)

    return out_p[..., :cout]


def reference_block(x_nhwc, w_dw, bn1, w_pw, bn2, *, stride=1, eps=1e-5):
    """Pure-JAX reference matching the PyTorch module semantics (eval BN)."""
    cin = x_nhwc.shape[-1]
    dw = w_dw.reshape(3, 3, 1, cin)
    y = lax.conv_general_dilated(
        x_nhwc, dw, window_strides=(stride, stride),
        padding=((1, 1), (1, 1)),
        dimension_numbers=("NHWC", "HWIO", "NHWC"),
        feature_group_count=cin)
    g1, b1, m1, v1 = bn1
    y = (y - m1) / jnp.sqrt(v1 + eps) * g1 + b1
    y = jnp.maximum(y, 0.0)
    y = jnp.einsum("nhwc,cd->nhwd", y, w_pw)
    g2, b2, m2, v2 = bn2
    y = (y - m2) / jnp.sqrt(v2 + eps) * g2 + b2
    return jnp.maximum(y, 0.0)


if __name__ == "__main__":
    key = jax.random.PRNGKey(0)
    N, H, W = 2, 16, 16
    in_planes, out_planes = 8, 16

    ks = jax.random.split(key, 10)
    x = jax.random.normal(ks[0], (N, H, W, in_planes), jnp.float32)

    # conv1: depthwise (PyTorch weight (Cin,1,3,3)) -> stored here as (3,3,Cin)
    w_dw = jax.random.normal(ks[1], (3, 3, in_planes), jnp.float32) * 0.2
    # conv2: pointwise (PyTorch weight (Cout,Cin,1,1)) -> stored as (Cin,Cout)
    w_pw = jax.random.normal(ks[2], (in_planes, out_planes), jnp.float32) * 0.2

    bn1 = (jax.random.uniform(ks[3], (in_planes,), jnp.float32, 0.5, 1.5),   # gamma
           jax.random.normal(ks[4], (in_planes,), jnp.float32) * 0.1,        # beta
           jax.random.normal(ks[5], (in_planes,), jnp.float32) * 0.1,        # running_mean
           jax.random.uniform(ks[6], (in_planes,), jnp.float32, 0.5, 1.5))   # running_var
    bn2 = (jax.random.uniform(ks[7], (out_planes,), jnp.float32, 0.5, 1.5),
           jax.random.normal(ks[8], (out_planes,), jnp.float32) * 0.1,
           jax.random.normal(ks[9], (out_planes,), jnp.float32) * 0.1,
           jnp.ones((out_planes,), jnp.float32))

    for stride in (1, 2):
        out = mobile_block_forward(x, w_dw, bn1, w_pw, bn2, stride=stride)
        out = jax.block_until_ready(out)
        ref = reference_block(x, w_dw, bn1, w_pw, bn2, stride=stride)
        # atol loosened slightly vs. pure-f32 because the 1x1 matmul operands
        # are quantized to bf16 (f32 accumulation).
        np.testing.assert_allclose(np.asarray(out), np.asarray(ref),
                                   rtol=2e-2, atol=5e-2)

    print("KERNEL_OK")
</pallas_src>

<mosaic_0001>
module attributes {stable_mosaic.version = 11 : i64} {
  func.func @_block_kernel(%arg0: i32, %arg1: i32, %arg2: memref<1x1x18x18x128xf32, #tpu.memory_space<vmem>>, %arg3: memref<3x3x128xf32, #tpu.memory_space<vmem>>, %arg4: memref<1x128xf32, #tpu.memory_space<vmem>>, %arg5: memref<128x128xbf16, #tpu.memory_space<vmem>>, %arg6: memref<1x128xf32, #tpu.memory_space<vmem>>, %arg7: memref<1x8x16x128xf32, #tpu.memory_space<vmem>>) attributes {dimension_semantics = [#tpu.dimension_semantics<parallel>, #tpu.dimension_semantics<parallel>], iteration_bounds = array<i64: 2, 2>, scalar_prefetch = 0 : i64, scratch_operands = 0 : i64, tpu.core_type = #tpu.core_type<tc>, window_params = [{transform_indices = @transform_0, window_bounds = array<i64: 1, 1, 18, 18, 128>}, {pipeline_mode = #tpu.pipeline_mode<synchronous>, transform_indices = @transform_1, window_bounds = array<i64: 3, 3, 128>}, {pipeline_mode = #tpu.pipeline_mode<synchronous>, transform_indices = @transform_2, window_bounds = array<i64: 1, 128>}, {pipeline_mode = #tpu.pipeline_mode<synchronous>, transform_indices = @transform_3, window_bounds = array<i64: 128, 128>}, {pipeline_mode = #tpu.pipeline_mode<synchronous>, transform_indices = @transform_4, window_bounds = array<i64: 1, 128>}, {transform_indices = @transform_5, window_bounds = array<i64: 1, 8, 16, 128>}]} {
    %c0 = arith.constant 0 : index
    %c0_0 = arith.constant 0 : index
    %c0_1 = arith.constant 0 : index
    %0 = vector.load %arg3[%c0, %c0_0, %c0_1] : memref<3x3x128xf32, #tpu.memory_space<vmem>>, vector<3x3x128xf32>
    %cst = arith.constant 0.000000e+00 : f32
    %1 = vector.broadcast %cst : f32 to vector<8x16x128xf32>
    %c8_i32 = arith.constant 8 : i32
    %2 = arith.muli %arg1, %c8_i32 : i32
    %c0_i32 = arith.constant 0 : i32
    %3 = arith.addi %2, %c0_i32 : i32
    %c0_2 = arith.constant 0 : index
    %c0_3 = arith.constant 0 : index
    %4 = arith.index_cast %3 : i32 to index
    %c0_4 = arith.constant 0 : index
    %c0_5 = arith.constant 0 : index
    %5 = vector.load %arg2[%c0_2, %c0_3, %4, %c0_4, %c0_5] : memref<1x1x18x18x128xf32, #tpu.memory_space<vmem>>, vector<1x1x8x16x128xf32>
    %6 = vector.shape_cast %5 : vector<1x1x8x16x128xf32> to vector<8x16x128xf32>
    %7 = vector.extract_strided_slice %0 {offsets = [0, 0, 0], sizes = [1, 1, 128], strides = [1, 1, 1]} : vector<3x3x128xf32> to vector<1x1x128xf32>
    %8 = vector.shape_cast %7 : vector<1x1x128xf32> to vector<128xf32>
    %9 = vector.shape_cast %8 : vector<128xf32> to vector<1x1x128xf32>
    %10 = vector.broadcast %9 : vector<1x1x128xf32> to vector<8x16x128xf32>
    %11 = arith.mulf %6, %10 : vector<8x16x128xf32>
    %12 = arith.addf %1, %11 : vector<8x16x128xf32>
    %c8_i32_6 = arith.constant 8 : i32
    %13 = arith.muli %arg1, %c8_i32_6 : i32
    %c0_i32_7 = arith.constant 0 : i32
    %14 = arith.addi %13, %c0_i32_7 : i32
    %c0_8 = arith.constant 0 : index
    %c0_9 = arith.constant 0 : index
    %15 = arith.index_cast %14 : i32 to index
    %c1 = arith.constant 1 : index
    %c0_10 = arith.constant 0 : index
    %16 = vector.load %arg2[%c0_8, %c0_9, %15, %c1, %c0_10] : memref<1x1x18x18x128xf32, #tpu.memory_space<vmem>>, vector<1x1x8x16x128xf32>
    %17 = vector.shape_cast %16 : vector<1x1x8x16x128xf32> to vector<8x16x128xf32>
    %18 = vector.extract_strided_slice %0 {offsets = [0, 1, 0], sizes = [1, 1, 128], strides = [1, 1, 1]} : vector<3x3x128xf32> to vector<1x1x128xf32>
    %19 = vector.shape_cast %18 : vector<1x1x128xf32> to vector<128xf32>
    %20 = vector.shape_cast %19 : vector<128xf32> to vector<1x1x128xf32>
    %21 = vector.broadcast %20 : vector<1x1x128xf32> to vector<8x16x128xf32>
    %22 = arith.mulf %17, %21 : vector<8x16x128xf32>
    %23 = arith.addf %12, %22 : vector<8x16x128xf32>
    %c8_i32_11 = arith.constant 8 : i32
    %24 = arith.muli %arg1, %c8_i32_11 : i32
    %c0_i32_12 = arith.constant 0 : i32
    %25 = arith.addi %24, %c0_i32_12 : i32
    %c0_13 = arith.constant 0 : index
    %c0_14 = arith.constant 0 : index
    %26 = arith.index_cast %25 : i32 to index
    %c2 = arith.constant 2 : index
    %c0_15 = arith.constant 0 : index
    %27 = vector.load %arg2[%c0_13, %c0_14, %26, %c2, %c0_15] : memref<1x1x18x18x128xf32, #tpu.memory_space<vmem>>, vector<1x1x8x16x128xf32>
    %28 = vector.shape_cast %27 : vector<1x1x8x16x128xf32> to vector<8x16x128xf32>
    %29 = vector.extract_strided_slice %0 {offsets = [0, 2, 0], sizes = [1, 1, 128], strides = [1, 1, 1]} : vector<3x3x128xf32> to vector<1x1x128xf32>
    %30 = vector.shape_cast %29 : vector<1x1x128xf32> to vector<128xf32>
    %31 = vector.shape_cast %30 : vector<128xf32> to vector<1x1x128xf32>
    %32 = vector.broadcast %31 : vector<1x1x128xf32> to vector<8x16x128xf32>
    %33 = arith.mulf %28, %32 : vector<8x16x128xf32>
    %34 = arith.addf %23, %33 : vector<8x16x128xf32>
    %c8_i32_16 = arith.constant 8 : i32
    %35 = arith.muli %arg1, %c8_i32_16 : i32
    %c1_i32 = arith.constant 1 : i32
    %36 = arith.addi %35, %c1_i32 : i32
    %c0_17 = arith.constant 0 : index
    %c0_18 = arith.constant 0 : index
    %37 = arith.index_cast %36 : i32 to index
    %c0_19 = arith.constant 0 : index
    %c0_20 = arith.constant 0 : index
    %38 = vector.load %arg2[%c0_17, %c0_18, %37, %c0_19, %c0_20] : memref<1x1x18x18x128xf32, #tpu.memory_space<vmem>>, vector<1x1x8x16x128xf32>
    %39 = vector.shape_cast %38 : vector<1x1x8x16x128xf32> to vector<8x16x128xf32>
    %40 = vector.extract_strided_slice %0 {offsets = [1, 0, 0], sizes = [1, 1, 128], strides = [1, 1, 1]} : vector<3x3x128xf32> to vector<1x1x128xf32>
    %41 = vector.shape_cast %40 : vector<1x1x128xf32> to vector<128xf32>
    %42 = vector.shape_cast %41 : vector<128xf32> to vector<1x1x128xf32>
    %43 = vector.broadcast %42 : vector<1x1x128xf32> to vector<8x16x128xf32>
    %44 = arith.mulf %39, %43 : vector<8x16x128xf32>
    %45 = arith.addf %34, %44 : vector<8x16x128xf32>
    %c8_i32_21 = arith.constant 8 : i32
    %46 = arith.muli %arg1, %c8_i32_21 : i32
    %c1_i32_22 = arith.constant 1 : i32
    %47 = arith.addi %46, %c1_i32_22 : i32
    %c0_23 = arith.constant 0 : index
    %c0_24 = arith.constant 0 : index
    %48 = arith.index_cast %47 : i32 to index
    %c1_25 = arith.constant 1 : index
    %c0_26 = arith.constant 0 : index
    %49 = vector.load %arg2[%c0_23, %c0_24, %48, %c1_25, %c0_26] : memref<1x1x18x18x128xf32, #tpu.memory_space<vmem>>, vector<1x1x8x16x128xf32>
    %50 = vector.shape_cast %49 : vector<1x1x8x16x128xf32> to vector<8x16x128xf32>
    %51 = vector.extract_strided_slice %0 {offsets = [1, 1, 0], sizes = [1, 1, 128], strides = [1, 1, 1]} : vector<3x3x128xf32> to vector<1x1x128xf32>
    %52 = vector.shape_cast %51 : vector<1x1x128xf32> to vector<128xf32>
    %53 = vector.shape_cast %52 : vector<128xf32> to vector<1x1x128xf32>
    %54 = vector.broadcast %53 : vector<1x1x128xf32> to vector<8x16x128xf32>
    %55 = arith.mulf %50, %54 : vector<8x16x128xf32>
    %56 = arith.addf %45, %55 : vector<8x16x128xf32>
    %c8_i32_27 = arith.constant 8 : i32
    %57 = arith.muli %arg1, %c8_i32_27 : i32
    %c1_i32_28 = arith.constant 1 : i32
    %58 = arith.addi %57, %c1_i32_28 : i32
    %c0_29 = arith.constant 0 : index
    %c0_30 = arith.constant 0 : index
    %59 = arith.index_cast %58 : i32 to index
    %c2_31 = arith.constant 2 : index
    %c0_32 = arith.constant 0 : index
    %60 = vector.load %arg2[%c0_29, %c0_30, %59, %c2_31, %c0_32] : memref<1x1x18x18x128xf32, #tpu.memory_space<vmem>>, vector<1x1x8x16x128xf32>
    %61 = vector.shape_cast %60 : vector<1x1x8x16x128xf32> to vector<8x16x128xf32>
    %62 = vector.extract_strided_slice %0 {offsets = [1, 2, 0], sizes = [1, 1, 128], strides = [1, 1, 1]} : vector<3x3x128xf32> to vector<1x1x128xf32>
    %63 = vector.shape_cast %62 : vector<1x1x128xf32> to vector<128xf32>
    %64 = vector.shape_cast %63 : vector<128xf32> to vector<1x1x128xf32>
    %65 = vector.broadcast %64 : vector<1x1x128xf32> to vector<8x16x128xf32>
    %66 = arith.mulf %61, %65 : vector<8x16x128xf32>
    %67 = arith.addf %56, %66 : vector<8x16x128xf32>
    %c8_i32_33 = arith.constant 8 : i32
    %68 = arith.muli %arg1, %c8_i32_33 : i32
    %c2_i32 = arith.constant 2 : i32
    %69 = arith.addi %68, %c2_i32 : i32
    %c0_34 = arith.constant 0 : index
    %c0_35 = arith.constant 0 : index
    %70 = arith.index_cast %69 : i32 to index
    %c0_36 = arith.constant 0 : index
    %c0_37 = arith.constant 0 : index
    %71 = vector.load %arg2[%c0_34, %c0_35, %70, %c0_36, %c0_37] : memref<1x1x18x18x128xf32, #tpu.memory_space<vmem>>, vector<1x1x8x16x128xf32>
    %72 = vector.shape_cast %71 : vector<1x1x8x16x128xf32> to vector<8x16x128xf32>
    %73 = vector.extract_strided_slice %0 {offsets = [2, 0, 0], sizes = [1, 1, 128], strides = [1, 1, 1]} : vector<3x3x128xf32> to vector<1x1x128xf32>
    %74 = vector.shape_cast %73 : vector<1x1x128xf32> to vector<128xf32>
    %75 = vector.shape_cast %74 : vector<128xf32> to vector<1x1x128xf32>
    %76 = vector.broadcast %75 : vector<1x1x128xf32> to vector<8x16x128xf32>
    %77 = arith.mulf %72, %76 : vector<8x16x128xf32>
    %78 = arith.addf %67, %77 : vector<8x16x128xf32>
    %c8_i32_38 = arith.constant 8 : i32
    %79 = arith.muli %arg1, %c8_i32_38 : i32
    %c2_i32_39 = arith.constant 2 : i32
    %80 = arith.addi %79, %c2_i32_39 : i32
    %c0_40 = arith.constant 0 : index
    %c0_41 = arith.constant 0 : index
    %81 = arith.index_cast %80 : i32 to index
    %c1_42 = arith.constant 1 : index
    %c0_43 = arith.constant 0 : index
    %82 = vector.load %arg2[%c0_40, %c0_41, %81, %c1_42, %c0_43] : memref<1x1x18x18x128xf32, #tpu.memory_space<vmem>>, vector<1x1x8x16x128xf32>
    %83 = vector.shape_cast %82 : vector<1x1x8x16x128xf32> to vector<8x16x128xf32>
    %84 = vector.extract_strided_slice %0 {offsets = [2, 1, 0], sizes = [1, 1, 128], strides = [1, 1, 1]} : vector<3x3x128xf32> to vector<1x1x128xf32>
    %85 = vector.shape_cast %84 : vector<1x1x128xf32> to vector<128xf32>
    %86 = vector.shape_cast %85 : vector<128xf32> to vector<1x1x128xf32>
    %87 = vector.broadcast %86 : vector<1x1x128xf32> to vector<8x16x128xf32>
    %88 = arith.mulf %83, %87 : vector<8x16x128xf32>
    %89 = arith.addf %78, %88 : vector<8x16x128xf32>
    %c8_i32_44 = arith.constant 8 : i32
    %90 = arith.muli %arg1, %c8_i32_44 : i32
    %c2_i32_45 = arith.constant 2 : i32
    %91 = arith.addi %90, %c2_i32_45 : i32
    %c0_46 = arith.constant 0 : index
    %c0_47 = arith.constant 0 : index
    %92 = arith.index_cast %91 : i32 to index
    %c2_48 = arith.constant 2 : index
    %c0_49 = arith.constant 0 : index
    %93 = vector.load %arg2[%c0_46, %c0_47, %92, %c2_48, %c0_49] : memref<1x1x18x18x128xf32, #tpu.memory_space<vmem>>, vector<1x1x8x16x128xf32>
    %94 = vector.shape_cast %93 : vector<1x1x8x16x128xf32> to vector<8x16x128xf32>
    %95 = vector.extract_strided_slice %0 {offsets = [2, 2, 0], sizes = [1, 1, 128], strides = [1, 1, 1]} : vector<3x3x128xf32> to vector<1x1x128xf32>
    %96 = vector.shape_cast %95 : vector<1x1x128xf32> to vector<128xf32>
    %97 = vector.shape_cast %96 : vector<128xf32> to vector<1x1x128xf32>
    %98 = vector.broadcast %97 : vector<1x1x128xf32> to vector<8x16x128xf32>
    %99 = arith.mulf %94, %98 : vector<8x16x128xf32>
    %100 = arith.addf %89, %99 : vector<8x16x128xf32>
    %c0_50 = arith.constant 0 : index
    %c0_51 = arith.constant 0 : index
    %101 = vector.load %arg4[%c0_50, %c0_51] : memref<1x128xf32, #tpu.memory_space<vmem>>, vector<1x128xf32>
    %102 = vector.shape_cast %101 : vector<1x128xf32> to vector<128xf32>
    %103 = vector.shape_cast %102 : vector<128xf32> to vector<1x1x128xf32>
    %104 = vector.broadcast %103 : vector<1x1x128xf32> to vector<8x16x128xf32>
    %105 = arith.addf %100, %104 : vector<8x16x128xf32>
    %cst_52 = arith.constant 0.000000e+00 : f32
    %106 = vector.broadcast %cst_52 : f32 to vector<8x16x128xf32>
    %107 = arith.maximumf %105, %106 : vector<8x16x128xf32>
    %108 = vector.shape_cast %107 : vector<8x16x128xf32> to vector<128x128xf32>
    %109 = arith.truncf %108 : vector<128x128xf32> to vector<128x128xbf16>
    %c0_53 = arith.constant 0 : index
    %c0_54 = arith.constant 0 : index
    %110 = vector.load %arg5[%c0_53, %c0_54] : memref<128x128xbf16, #tpu.memory_space<vmem>>, vector<128x128xbf16>
    %cst_55 = arith.constant dense<0.000000e+00> : vector<128x128xf32>
    %111 = tpu.matmul %109, %110, %cst_55 {dimension_numbers = #tpu.dot_dimension_numbers<[1], [0], [0], [1], [0, 0, 1, 1], [], []>} : vector<128x128xbf16>, vector<128x128xbf16>, vector<128x128xf32> -> vector<128x128xf32>
    %c0_56 = arith.constant 0 : index
    %c0_57 = arith.constant 0 : index
    %112 = vector.load %arg6[%c0_56, %c0_57] : memref<1x128xf32, #tpu.memory_space<vmem>>, vector<1x128xf32>
    %113 = vector.shape_cast %112 : vector<1x128xf32> to vector<128xf32>
    %114 = vector.shape_cast %113 : vector<128xf32> to vector<1x128xf32>
    %115 = vector.broadcast %114 : vector<1x128xf32> to vector<128x128xf32>
    %116 = arith.addf %111, %115 : vector<128x128xf32>
    %cst_58 = arith.constant 0.000000e+00 : f32
    %117 = vector.broadcast %cst_58 : f32 to vector<128x128xf32>
    %118 = arith.maximumf %116, %117 : vector<128x128xf32>
    %119 = vector.shape_cast %118 : vector<128x128xf32> to vector<8x16x128xf32>
    %c0_59 = arith.constant 0 : index
    %c0_60 = arith.constant 0 : index
    %c0_61 = arith.constant 0 : index
    %c0_62 = arith.constant 0 : index
    %120 = vector.load %arg7[%c0_59, %c0_60, %c0_61, %c0_62] : memref<1x8x16x128xf32, #tpu.memory_space<vmem>>, vector<1x8x16x128xf32>
    %121 = vector.shape_cast %120 : vector<1x8x16x128xf32> to vector<8x16x128xf32>
    %122 = vector.shape_cast %119 : vector<8x16x128xf32> to vector<1x8x16x128xf32>
    tpu.vector_store %arg7[%c0_59, %c0_60, %c0_61, %c0_62], %122 {strides = array<i32>} : memref<1x8x16x128xf32, #tpu.memory_space<vmem>>, vector<1x8x16x128xf32>,
    return
  }
  func.func @transform_0(%arg0: i32, %arg1: i32) -> (i32, i32, i32, i32, i32) {
    %c0_i32 = arith.constant 0 : i32
    %c0_i32_0 = arith.constant 0 : i32
    %c0_i32_1 = arith.constant 0 : i32
    %c0_i32_2 = arith.constant 0 : i32
    %c0_i32_3 = arith.constant 0 : i32
    return %arg0, %c0_i32, %c0_i32_0, %c0_i32_1, %c0_i32_2 : i32, i32, i32, i32, i32
  }
  func.func @transform_1(%arg0: i32, %arg1: i32) -> (i32, i32, i32) {
    %c0_i32 = arith.constant 0 : i32
    %c0_i32_0 = arith.constant 0 : i32
    %c0_i32_1 = arith.constant 0 : i32
    %c0_i32_2 = arith.constant 0 : i32
    return %c0_i32, %c0_i32_0, %c0_i32_1 : i32, i32, i32
  }
  func.func @transform_2(%arg0: i32, %arg1: i32) -> (i32, i32) {
    %c0_i32 = arith.constant 0 : i32
    %c0_i32_0 = arith.constant 0 : i32
    %c0_i32_1 = arith.constant 0 : i32
    return %c0_i32, %c0_i32_0 : i32, i32
  }
  func.func @transform_3(%arg0: i32, %arg1: i32) -> (i32, i32) {
    %c0_i32 = arith.constant 0 : i32
    %c0_i32_0 = arith.constant 0 : i32
    %c0_i32_1 = arith.constant 0 : i32
    return %c0_i32, %c0_i32_0 : i32, i32
  }
  func.func @transform_4(%arg0: i32, %arg1: i32) -> (i32, i32) {
    %c0_i32 = arith.constant 0 : i32
    %c0_i32_0 = arith.constant 0 : i32
    %c0_i32_1 = arith.constant 0 : i32
    return %c0_i32, %c0_i32_0 : i32, i32
  }
  func.func @transform_5(%arg0: i32, %arg1: i32) -> (i32, i32, i32, i32) {
    %c0_i32 = arith.constant 0 : i32
    %c0_i32_0 = arith.constant 0 : i32
    %c0_i32_1 = arith.constant 0 : i32
    return %arg0, %arg1, %c0_i32, %c0_i32_0 : i32, i32, i32, i32
  }
}

</mosaic_0001>

<bundles_post_ra>
// kernel: tpu_custom_call.1
= control target key start
LH: loop header
LB: loop body
LE: loop exit
PB: predicated region body
PF: predicated region fallthrough
CT: control target
= control target key end

     0   :  { %10 = vsyncpa [#allocation3], 0  ;;  %s2048_s0 = inlined_call_operand.vmem [shape: f32[2,1,18,18,128], index: 0, kind: input, shape index: {}]   ;;  %s2049_s1 = inlined_call_operand.vmem [shape: f32[3,3,128], index: 1, kind: input, shape index: {}]   ;;  %s2050_s2 = inlined_call_operand.vmem [shape: f32[1,128], index: 2, kind: input, shape index: {}]   ;;  %s2051_s3 = inlined_call_operand.vmem [shape: bf16[128,128], index: 3, kind: input, shape index: {}]   ;;  %s2052_s4 = inlined_call_operand.vmem [shape: f32[1,128], index: 4, kind: input, shape index: {}]   ;;  %s2053_s5 = inlined_call_operand.hbm [shape: f32[2,16,16,128], index: 5, kind: output, shape index: {}]  }
   0x1   :  { %12 = vsyncpa [#allocation3 + $0x1], 0  ;;  %s1374_s18 = smov 0   ;;  %s1376_s19 = smov 0  }
   0x2   :  { %s1378_s20 = smov 0   ;;  %s1380_s21 = smov 0  }
   0x3   :  { %s1382_s22 = smov 0   ;;  %s1384_s23 = smov 0  }
   0x4   :  { %s1386_s24 = smov 0   ;;  %s1388_s25 = smov 0  }
   0x5 LB: > { %s989_s26 = sadd.s32 4294967295, %s1340_s25   ;;  %s990_s27 = sadd.s32 4294967294, %s1340_s25   ;;  %s1340_s25 = sphi %s1388_s25, %s18_s25   ;;  %s1336_s24 = sphi %s1386_s24, %s2129_s24   ;;  %s1332_s23 = sphi %s1384_s23, %s2128_s23   ;;  %s1328_s22 = sphi %s1382_s22, %s2127_s22   ;;  %s1324_s21 = sphi %s1380_s21, %s2126_s21   ;;  %s1320_s20 = sphi %s1378_s20, %s2125_s20   ;;  %s1316_s19 = sphi %s1376_s19, %s2124_s19   ;;  %s1312_s18 = sphi %s1374_s18, %s2123_s18  }
   0x6   : > { %s27_s28 = sadd.s32 1, %s1332_s23  ;;  %s30_s29 = sadd.s32 1, %s1336_s24 }
   0x7   : > { %p28_p0 = scmp.ge.s32.totalorder %s27_s28, 2  ;;  %p159_p1 = scmp.ne.s32.totalorder %s1320_s20, %s1316_s19 }
   0x8   : > { %p160_p2 = scmp.eq.s32.totalorder %s989_s26, 3  ;;  %p165_p5 = scmp.ne.s32.totalorder %s1316_s19, %s1312_s18 }
   0x9   : > { %s2131_s28 = smov (%p28_p0, %s27_s28), 0  ;;  %s2133_s29 = smov (!%p28_p0, %s30_s29), %s1336_s24 }
   0xa   : > { %s145_s30 = ssub.s32 %s1332_s23, %s2131_s28  ;;  %p1425_p3 = por %p160_p2, %p159_p1 }
   0xb   : > { %p32_p4 = scmp.ge.s32.totalorder %s2133_s29, 2  ;;  %p166_p6 = scmp.eq.s32.totalorder %s990_s27, 3 }
   0xc   : > { %p993_p7 = scmp.ge.s32.totalorder %s1340_s25, 1  ;;  %p204_p9 = scmp.lt.s32.totalorder %s1340_s25, 5 }
   0xd   : > { %s2135_s29 = smov (%p32_p4, %s2133_s29), 0  ;;  %p1434_p8 = por %p166_p6, %p165_p5 }
   0xe   : > { %s144_s8 = ssub.s32 %s1336_s24, %s2135_s29  ;;  %s149_s9 = sadd.s32 1, %s1320_s20 }
   0xf   : > { %s146_s10 = sor.u32 %s145_s30, %s144_s8  ;;  %p205_p10 = pnand %p993_p7, %p204_p9 }
  0x10   : > { %p147_p11 = scmp.eq.s32.totalorder %s146_s10, 0 }
  0x11   : > { %208 = sbr.rel (%p205_p10) target bundleno = 271 (0x10f), region = 40 }
  0x12   : > { %s1443_s11 = scalar_select %p147_p11, %s1320_s20, %s149_s9  }
  0x16   : > { %v1144_v0 = vld [vmem:[%s2051_s3 + $0x38] sm:$0xff]  ;;  %p232_p12 = scmp.lt.s32.totalorder %s1328_s22, 1  ;;  %v1143_v1 = vld [vmem:[%s2051_s3 + $0x30] sm:$0xff]  ;;  %v238_v2 = vld [vmem:[%s2049_s1] sm:$0x7]  ;;  %s997_s27 = smul.u32 192, %s1324_s21 }
  0x17   : > { %803 = vmatpush.bf16.msra.mxu0 %v1144_v0  ;;  %1146 = vmatpush.bf16.msra.mxu1 %v1144_v0  ;;  %v239_v3 = vld [vmem:[%s2049_s1 + $0x4] sm:$0x7]  ;;  %v1460_v4 = vperm.slane %v238_v2, 0  ;;  %v1462_v5 = vperm.slane %v238_v2, 1  ;;  %v1142_v6 = vld [vmem:[%s2051_s3 + $0x28] sm:$0xff]  ;;  %v1473_v8 = vperm.slane %v238_v2, 2 }
  0x18   : > { %s233_s16 = scalar_select %p232_p12, %s1328_s22, 1  ;;  %1147 = vmatpush.bf16.msra.mxu2 %v1144_v0  ;;  %1148 = vmatpush.bf16.msra.mxu3 %v1144_v0  ;;  %v240_v7 = vld [vmem:[%s2049_s1 + $0x8] sm:$0x7]  ;;  %v1477_v9 = vperm.slane %v239_v3, 0  ;;  %v1141_v10 = vld [vmem:[%s2051_s3 + $0x20] sm:$0xff]  ;;  %v1485_v14 = vperm.slane %v239_v3, 1 }
  0x19   : > { %v1487_v15 = vperm.slane %v239_v3, 2  ;;  %v1495_v22 = vperm.slane %v240_v7, 0  ;;  %v1509_v29 = vperm.slane %v240_v7, 1  ;;  %v1524_v36 = vperm.slane %v240_v7, 2  ;;  %v1140_v49 = vld [vmem:[%s2051_s3 + $0x18] sm:$0xff]  ;;  %s1145_s12 = sshll.u32 %s1324_s21, 4 }
  0x1a   : > { %s1170_s30 = smul.u32 432, %s233_s16  ;;  %s1133_s13 = sshll.u32 %s1328_s22, 5 }
  0x1b   : > { %804 = vmatpush.bf16.msra.mxu0 %v1143_v1  ;;  %1149 = vmatpush.bf16.msra.mxu1 %v1143_v1  ;;  %s897_s14 = sadd.s32 %s1145_s12, %s1133_s13 }
  0x1c   : > { %s236_s15 = scalar_lea.vmem %s2048_s0, %s1170_s30  ;;  %1150 = vmatpush.bf16.msra.mxu2 %v1143_v1  ;;  %1151 = vmatpush.bf16.msra.mxu3 %v1143_v1 }
  0x1d   : > { %s1475_s26 = scalar_lea.vmem %s236_s15, %s997_s27  ;;  %s1134_s15 = sshll.u32 %s897_s14, 3 }
  0x1e   : > { %v244_v11 = vld [vmem:[%s1475_s26] sm:$0xff]  ;;  %v245_v12 = vld [vmem:[%s1475_s26 + $0x8] sm:$0xff]  ;;  %v1501_v26 = vld [vmem:[%s1475_s26 + $0x18] sm:$0xff]  ;;  %s899_s21 = scalar_lea.hbm %s2053_s5, %s1134_s15  ;;  %s1266_s14 = scalar_lea.hbm %s2053_s5, 512 }
  0x1f   : > { %v293_v13 = vld [vmem:[%s1475_s26 + $0x1] sm:$0xff]  ;;  %v261_v16 = vmul.f32 %v1460_v4, %v244_v11  ;;  %v262_v17 = vmul.f32 %v1460_v4, %v245_v12  ;;  %v294_v18 = vld [vmem:[%s1475_s26 + $0x9] sm:$0xff]  ;;  %805 = vmatpush.bf16.msra.mxu0 %v1142_v6  ;;  %1152 = vmatpush.bf16.msra.mxu1 %v1142_v6  ;;  %v1507_v28 = vld [vmem:[%s1475_s26 + $0x19] sm:$0xff]  ;;  %v411_v31 = vmul.f32 %v1501_v26, %v1477_v9  ;;  %s902_s8 = sshll.u32 %s899_s21, 4  ;;  %s903_s8 = int_to_ptr.hbm [resolvable:$true] %s902_s8 }
  0x20   : > { %v310_v19 = vmul.f32 %v1462_v5, %v293_v13  ;;  %v342_v20 = vld [vmem:[%s1475_s26 + $0x2] sm:$0xff]  ;;  %v343_v21 = vld [vmem:[%s1475_s26 + $0xa] sm:$0xff]  ;;  %v311_v23 = vmul.f32 %v1462_v5, %v294_v18  ;;  %1153 = vmatpush.bf16.msra.mxu2 %v1142_v6  ;;  %1154 = vmatpush.bf16.msra.mxu3 %v1142_v6  ;;  %v1519_v34 = vld [vmem:[%s1475_s26 + $0x1a] sm:$0xff]  ;;  %v460_v38 = vmul.f32 %v1507_v28, %v1485_v14  ;;  %s1260_s27 = sshra.s32 %s903_s8, 4  ;;  %s1261_s27 = int_to_ptr.hbm [resolvable:$true] %s1260_s27 }
  0x21   : > { %v359_v24 = vmul.f32 %v1473_v8, %v342_v20  ;;  %v360_v25 = vmul.f32 %v1473_v8, %v343_v21  ;;  %v1504_v27 = vld [vmem:[%s1475_s26 + $0x20] sm:$0xff]  ;;  %v509_v40 = vmul.f32 %v1519_v34, %v1487_v15  ;;  %v1533_v41 = vld [vmem:[%s1475_s26 + $0x30] sm:$0xff]  ;;  %v1536_v42 = vld [vmem:[%s1475_s26 + $0x38] sm:$0xff]  ;;  %p1267_p2 = scmp.lt.s32.totalorder %s1261_s27, %s2053_s5 }
  0x22   : > { %v326_v30 = vadd.f32 %v310_v19, %v261_v16  ;;  %v412_v32 = vmul.f32 %v1504_v27, %v1477_v9  ;;  %v1516_v33 = vld [vmem:[%s1475_s26 + $0x21] sm:$0xff]  ;;  %v327_v37 = vadd.f32 %v311_v23, %v262_v17  ;;  %v561_v45 = vmul.f32 %v1533_v41, %v1495_v22  ;;  %v1545_v47 = vld [vmem:[%s1475_s26 + $0x31] sm:$0xff]  ;;  %v1548_v48 = vld [vmem:[%s1475_s26 + $0x39] sm:$0xff] }
  0x23   : > { %v1522_v35 = vld [vmem:[%s1475_s26 + $0x22] sm:$0xff]  ;;  %v461_v39 = vmul.f32 %v1516_v33, %v1485_v14  ;;  %v562_v46 = vmul.f32 %v1536_v42, %v1495_v22  ;;  %806 = vmatpush.bf16.msra.mxu0 %v1141_v10  ;;  %1155 = vmatpush.bf16.msra.mxu1 %v1141_v10  ;;  %v610_v51 = vmul.f32 %v1545_v47, %v1509_v29  ;;  %v1558_v53 = vld [vmem:[%s1475_s26 + $0x32] sm:$0xff]  ;;  %v1561_v54 = vld [vmem:[%s1475_s26 + $0x3a] sm:$0xff] }
  0x24   : > { %v375_v43 = vadd.f32 %v359_v24, %v326_v30  ;;  %v510_v44 = vmul.f32 %v1522_v35, %v1487_v15  ;;  %v376_v50 = vadd.f32 %v360_v25, %v327_v37  ;;  %v611_v52 = vmul.f32 %v1548_v48, %v1509_v29  ;;  %1156 = vmatpush.bf16.msra.mxu2 %v1141_v10  ;;  %v1570_v58 = vld [vmem:[%s1475_s26 + $0x48] sm:$0xff]  ;;  %v1579_v63 = vld [vmem:[%s1475_s26 + $0x50] sm:$0xff] }
  0x25   : > { %1157 = vmatpush.bf16.msra.mxu3 %v1141_v10  ;;  %v659_v56 = vmul.f32 %v1558_v53, %v1524_v36  ;;  %v1567_v57 = vmul.f32 %v1561_v54, %v1524_v36  ;;  %v265_v60 = vmul.f32 %v1533_v41, %v1460_v4  ;;  %v266_v61 = vmul.f32 %v1536_v42, %v1460_v4  ;;  %v1588_v6 = vld [vmem:[%s1475_s26 + $0x49] sm:$0xff]  ;;  %v1591_v7 = vld [vmem:[%s1475_s26 + $0x51] sm:$0xff] }
  0x26   : > { %v427_v55 = vadd.f32 %v411_v31, %v375_v43  ;;  %v428_v59 = vadd.f32 %v412_v32, %v376_v50  ;;  %v314_v62 = vmul.f32 %v1545_v47, %v1462_v5  ;;  %v315_v1 = vmul.f32 %v1548_v48, %v1462_v5  ;;  %v1139_v10 = vld [vmem:[%s2051_s3 + $0x10] sm:$0xff]  ;;  %v1628_v50 = vld [vmem:[%s2050_s2] ss:$0 sm:$0xff] }
  0x27   : > { %v363_v2 = vmul.f32 %v1558_v53, %v1473_v8  ;;  %v364_v3 = vmul.f32 %v1561_v54, %v1473_v8  ;;  %807 = vmatpush.bf16.msra.mxu0 %v1140_v49  ;;  %1158 = vmatpush.bf16.msra.mxu1 %v1140_v49  ;;  %v415_v13 = vmul.f32 %v1570_v58, %v1477_v9  ;;  %v1599_v16 = vld [vmem:[%s1475_s26 + $0x4a] sm:$0xff]  ;;  %v1602_v17 = vld [vmem:[%s1475_s26 + $0x52] sm:$0xff] }
  0x28   : > { %v476_v0 = vadd.f32 %v460_v38, %v427_v55  ;;  %v477_v11 = vadd.f32 %v461_v39, %v428_v59  ;;  %v330_v12 = vadd.f32 %v314_v62, %v265_v60  ;;  %1159 = vmatpush.bf16.msra.mxu2 %v1140_v49  ;;  %v331_v19 = vadd.f32 %v315_v1, %v266_v61  ;;  %v1615_v38 = vld [vmem:[%s1475_s26 + $0x60] sm:$0xff]  ;;  %v1138_v39 = vld [vmem:[%s2051_s3 + $0x8] sm:$0xff] }
  0x29   : > { %1160 = vmatpush.bf16.msra.mxu3 %v1140_v49  ;;  %v416_v20 = vmul.f32 %v1579_v63, %v1477_v9  ;;  %v464_v24 = vmul.f32 %v1588_v6, %v1485_v14  ;;  %v465_v25 = vmul.f32 %v1591_v7, %v1485_v14  ;;  %v513_v32 = vmul.f32 %v1599_v16, %v1487_v15  ;;  %v1633_v59 = vld [vmem:[%s1475_s26 + $0x61] sm:$0xff]  ;;  %v1636_v60 = vld [vmem:[%s1475_s26 + $0x69] sm:$0xff] }
  0x2a   : > { %v525_v18 = vadd.f32 %v509_v40, %v476_v0  ;;  %v526_v21 = vadd.f32 %v510_v44, %v477_v11  ;;  %v379_v23 = vadd.f32 %v363_v2, %v330_v12  ;;  %v380_v31 = vadd.f32 %v364_v3, %v331_v19  ;;  %v1621_v44 = vld [vmem:[%s1475_s26 + $0x68] sm:$0xff] }
  0x2b   : > { %v514_v37 = vmul.f32 %v1602_v17, %v1487_v15  ;;  %808 = vmatpush.bf16.msra.mxu0 %v1139_v10  ;;  %1161 = vmatpush.bf16.msra.mxu1 %v1139_v10  ;;  %v614_v0 = vmul.f32 %v1633_v59, %v1509_v29  ;;  %v1643_v1 = vld [vmem:[%s1475_s26 + $0x62] sm:$0xff]  ;;  %v1646_v2 = vld [vmem:[%s1475_s26 + $0x6a] sm:$0xff] }
  0x2c   : > { %v577_v30 = vadd.f32 %v561_v45, %v525_v18  ;;  %v578_v40 = vadd.f32 %v562_v46, %v526_v21  ;;  %v431_v43 = vadd.f32 %v415_v13, %v379_v23  ;;  %v565_v45 = vmul.f32 %v1615_v38, %v1495_v22  ;;  %1162 = vmatpush.bf16.msra.mxu2 %v1139_v10 }
  0x2d   : > { %1163 = vmatpush.bf16.msra.mxu3 %v1139_v10  ;;  %v432_v55 = vadd.f32 %v416_v20, %v380_v31  ;;  %v566_v46 = vmul.f32 %v1621_v44, %v1495_v22  ;;  %v663_v11 = vmul.f32 %v1643_v1, %v1524_v36  ;;  %v664_v12 = vmul.f32 %v1646_v2, %v1524_v36  ;;  %v1670_v31 = vld [vmem:[%s1475_s26 + $0x80] sm:$0xff] }
  0x2e   : > { %v626_v49 = vadd.f32 %v610_v51, %v577_v30  ;;  %v627_v61 = vadd.f32 %v611_v52, %v578_v40  ;;  %v480_v62 = vadd.f32 %v464_v24, %v431_v43  ;;  %v615_v51 = vmul.f32 %v1636_v60, %v1509_v29  ;;  %v1137_v52 = vld [vmem:[%s2051_s3] sm:$0xff]  ;;  %v1667_v30 = vld [vmem:[%s1475_s26 + $0x78] sm:$0xff]  ;;  %2086 = vst [vmem:[#allocation6_spill] sm:$0xff] %v1670_v31 }
  0x2f   : > { %v481_v10 = vadd.f32 %v465_v25, %v432_v55  ;;  %809 = vmatpush.bf16.msra.mxu0 %v1138_v39  ;;  %1164 = vmatpush.bf16.msra.mxu1 %v1138_v39  ;;  %v270_v21 = vmul.f32 %v1621_v44, %v1460_v4  ;;  %v319_v25 = vmul.f32 %v1636_v60, %v1462_v5 }
  0x30   : > { %v675_v3 = vadd.f32 %v659_v56, %v626_v49  ;;  %v676_v13 = vadd.f32 %v1567_v57, %v627_v61  ;;  %v529_v18 = vadd.f32 %v513_v32, %v480_v62  ;;  %v269_v56 = vmul.f32 %v1615_v38, %v1460_v4  ;;  %1165 = vmatpush.bf16.msra.mxu2 %v1138_v39  ;;  %v1677_v61 = vld [vmem:[%s1475_s26 + $0x79] sm:$0xff]  ;;  %v1680_v62 = vld [vmem:[%s1475_s26 + $0x81] sm:$0xff] }
  0x31   : > { %1166 = vmatpush.bf16.msra.mxu3 %v1138_v39  ;;  %v530_v20 = vadd.f32 %v514_v37, %v481_v10  ;;  %v318_v57 = vmul.f32 %v1633_v59, %v1462_v5  ;;  %2085 = vst [vmem:[#allocation5_spill] sm:$0xff] %v1667_v30  ;;  %v367_v39 = vmul.f32 %v1643_v1, %v1473_v8 }
  0x32   : > { %v695_v19 = vadd.f32 %v1628_v50, %v675_v3  ;;  %v696_v23 = vadd.f32 %v1628_v50, %v676_v13  ;;  %v581_v24 = vadd.f32 %v565_v45, %v529_v18  ;;  %v368_v40 = vmul.f32 %v1646_v2, %v1473_v8  ;;  %2087 = vst [vmem:[#allocation7_spill] sm:$0xff] %v1677_v61  ;;  %v1683_v3 = vld [vmem:[%s1475_s26 + $0x7a] sm:$0xff] }
  0x33   : > { %v582_v37 = vadd.f32 %v566_v46, %v530_v20  ;;  %810 = vmatpush.bf16.msra.mxu0 %v1137_v52  ;;  %1167 = vmatpush.bf16.msra.mxu1 %v1137_v52  ;;  %v334_v49 = vadd.f32 %v318_v57, %v269_v56  ;;  %v335_v55 = vadd.f32 %v319_v25, %v270_v21 }
  0x34   : > { %v711_v32 = vmax.f32 %v695_v19, 0.0  ;;  %v712_v43 = vmax.f32 %v696_v23, 0.0  ;;  %v630_v45 = vadd.f32 %v614_v0, %v581_v24  ;;  %2088 = vst [vmem:[#allocation8_spill] sm:$0xff] %v1680_v62  ;;  %1168 = vmatpush.bf16.msra.mxu2 %v1137_v52  ;;  %v419_v10 = vmul.f32 %v1667_v30, %v1477_v9  ;;  %v1690_v0 = vld [vmem:[%s1475_s26 + $0x82] sm:$0xff] }
  0x35   : > { %2089 = vst [vmem:[#allocation9_spill] sm:$0xff] %v1683_v3  ;;  %1169 = vmatpush.bf16.msra.mxu3 %v1137_v52  ;;  %v631_v46 = vadd.f32 %v615_v51, %v582_v37  ;;  %v420_v13 = vmul.f32 %v1670_v31, %v1477_v9  ;;  %v383_v19 = vadd.f32 %v367_v39, %v334_v49  ;;  %v1708_v37 = vld [vmem:[%s1475_s26 + $0x91] sm:$0xff]  ;;  %v1768_v31 = vld [vmem:[%s1475_s26 + $0xc8] sm:$0xff] }
  0x36   : > { %2090 = vst [vmem:[#allocation10_spill] sm:$0xff] %v1690_v0  ;;  %v727_v18 = vpack.c.bf16 %v712_v43, %v711_v32  ;;  %v679_v56 = vadd.f32 %v663_v11, %v630_v45  ;;  %v384_v20 = vadd.f32 %v368_v40, %v335_v55  ;;  %v468_v51 = vmul.f32 %v1677_v61, %v1485_v14  ;;  %v1705_v32 = vld [vmem:[%s1475_s26 + $0x98] sm:$0xff]  ;;  %v1782_v30 = vld [vmem:[%s1475_s26 + $0xc9] sm:$0xff] }
  0x37   : > { %v680_v21 = vadd.f32 %v664_v12, %v631_v46  ;;  %v469_v52 = vmul.f32 %v1680_v62, %v1485_v14  ;;  %v517_v23 = vmul.f32 %v1683_v3, %v1487_v15  ;;  %v435_v57 = vadd.f32 %v419_v10, %v383_v19  ;;  %v1702_v12 = vld [vmem:[%s1475_s26 + $0x90] sm:$0xff]  ;;  %2092 = vst [vmem:[#allocation12_spill] sm:$0xff] %v1705_v32  ;;  %v1716_v45 = vld [vmem:[%s1475_s26 + $0x99] sm:$0xff] }
  0x38   : > { %811 = vmatmul.bf16.vlgmr.msra.gmra.mxu0 %v727_v18  ;;  %v699_v24 = vadd.f32 %v1628_v50, %v679_v56  ;;  %v436_v11 = vadd.f32 %v420_v13, %v384_v20  ;;  %v518_v25 = vmul.f32 %v1690_v0, %v1487_v15  ;;  %2091 = vst [vmem:[#allocation11_spill] sm:$0xff] %v1702_v12  ;;  %v1723_v18 = vld [vmem:[%s1475_s26 + $0x92] sm:$0xff]  ;;  %v1726_v56 = vld [vmem:[%s1475_s26 + $0x9a] sm:$0xff]  ;;  %v1745_v3 = vld [vmem:[%s1475_s26 + $0xa9] sm:$0xff] }
  0x39   : > { %2093 = vst [vmem:[#allocation13_spill] sm:$0xff] %v1708_v37  ;;  %v700_v39 = vadd.f32 %v1628_v50, %v680_v21  ;;  %v569_v40 = vmul.f32 %v1702_v12, %v1495_v22  ;;  %v570_v43 = vmul.f32 %v1705_v32, %v1495_v22  ;;  %v618_v49 = vmul.f32 %v1708_v37, %v1509_v29  ;;  %v1742_v0 = vld [vmem:[%s1475_s26 + $0xb0] sm:$0xff] }
  0x3a   : > { %2094 = vst [vmem:[#allocation14_spill] sm:$0xff] %v1716_v45  ;;  %v715_v55 = vmax.f32 %v699_v24, 0.0  ;;  %v484_v46 = vadd.f32 %v468_v51, %v435_v57  ;;  %v485_v10 = vadd.f32 %v469_v52, %v436_v11  ;;  %v619_v13 = vmul.f32 %v1716_v45, %v1509_v29  ;;  %v1735_v24 = vld [vmem:[%s1475_s26 + $0xa8] sm:$0xff]  ;;  %v1748_v62 = vld [vmem:[%s1475_s26 + $0xb1] sm:$0xff] }
  0x3b   : > { %2095 = vst [vmem:[#allocation15_spill] sm:$0xff] %v1723_v18  ;;  %v716_v19 = vmax.f32 %v700_v39, 0.0  ;;  %v667_v20 = vmul.f32 %v1723_v18, %v1524_v36  ;;  %v668_v21 = vmul.f32 %v1726_v56, %v1524_v36  ;;  %v273_v51 = vmul.f32 %v1702_v12, %v1460_v4 }
  0x3c   : > { %2096 = vst [vmem:[#allocation16_spill] sm:$0xff] %v1726_v56  ;;  %v533_v52 = vadd.f32 %v517_v23, %v484_v46  ;;  %v534_v57 = vadd.f32 %v518_v25, %v485_v10  ;;  %v274_v11 = vmul.f32 %v1705_v32, %v1460_v4  ;;  %v322_v39 = vmul.f32 %v1708_v37, %v1462_v5  ;;  %v1757_v10 = vld [vmem:[%s1475_s26 + $0xaa] sm:$0xff] }
  0x3d   : > { %2097 = vst [vmem:[#allocation17_spill] sm:$0xff] %v1735_v24  ;;  %v729_v12 = vpack.c.bf16 %v716_v19, %v715_v55  ;;  %v323_v23 = vmul.f32 %v1716_v45, %v1462_v5  ;;  %v371_v25 = vmul.f32 %v1723_v18, %v1473_v8  ;;  %v372_v46 = vmul.f32 %v1726_v56, %v1473_v8  ;;  %v1762_v19 = vld [vmem:[%s1475_s26 + $0xb2] sm:$0xff]  ;;  %v1765_v45 = vld [vmem:[%s1475_s26 + $0xc0] sm:$0xff] }
  0x3e   : > { %2098 = vst [vmem:[#allocation18_spill] sm:$0xff] %v1745_v3  ;;  %v585_v37 = vadd.f32 %v569_v40, %v533_v52  ;;  %v586_v32 = vadd.f32 %v570_v43, %v534_v57  ;;  %v338_v61 = vadd.f32 %v322_v39, %v273_v51  ;;  %v423_v55 = vmul.f32 %v1735_v24, %v1477_v9  ;;  %v1777_v51 = vld [vmem:[%s1475_s26 + $0xc1] sm:$0xff] }
  0x3f   : > { %2099 = vst [vmem:[#allocation19_spill] sm:$0xff] %v1748_v62  ;;  %821 = vmatmul.bf16.vlgmr.msra.gmra.mxu1 %v729_v12  ;;  %v339_v18 = vadd.f32 %v323_v23, %v274_v11  ;;  %v424_v56 = vmul.f32 %v1742_v0, %v1477_v9  ;;  %v472_v40 = vmul.f32 %v1745_v3, %v1485_v14  ;;  %v1785_v12 = vld [vmem:[%s1475_s26 + $0xc2] sm:$0xff]  ;;  %v1788_v11 = vld [vmem:[%s1475_s26 + $0xca] sm:$0xff] }
  0x40   : > { %2100 = vst [vmem:[#allocation20_spill] sm:$0xff] %v1757_v10  ;;  %v473_v43 = vmul.f32 %v1748_v62, %v1485_v14  ;;  %v634_v52 = vadd.f32 %v618_v49, %v585_v37  ;;  %v635_v57 = vadd.f32 %v619_v13, %v586_v32  ;;  %v387_v39 = vadd.f32 %v371_v25, %v338_v61 }
  0x41   : > { %2101 = vst [vmem:[#allocation21_spill] sm:$0xff] %v1765_v45  ;;  %v521_v24 = vmul.f32 %v1757_v10, %v1487_v15  ;;  %v388_v23 = vadd.f32 %v372_v46, %v339_v18  ;;  %v522_v3 = vmul.f32 %v1762_v19, %v1487_v15  ;;  %v573_v62 = vmul.f32 %v1765_v45, %v1495_v22 }
  0x42   : > { %2102 = vst [vmem:[#allocation22_spill] sm:$0xff] %v1768_v31  ;;  %v574_v32 = vmul.f32 %v1768_v31, %v1495_v22  ;;  %v683_v61 = vadd.f32 %v667_v20, %v634_v52  ;;  %v684_v37 = vadd.f32 %v668_v21, %v635_v57  ;;  %v439_v49 = vadd.f32 %v423_v55, %v387_v39 }
  0x43   : > { %2103 = vst [vmem:[#allocation23_spill] sm:$0xff] %v1788_v11  ;;  %v622_v13 = vmul.f32 %v1777_v51, %v1509_v29  ;;  %v440_v25 = vadd.f32 %v424_v56, %v388_v23  ;;  %v623_v10 = vmul.f32 %v1782_v30, %v1509_v29  ;;  %v671_v18 = vmul.f32 %v1785_v12, %v1524_v36 }
  0x44   : > { %v672_v46 = vmul.f32 %v1788_v11, %v1524_v36  ;;  %v703_v45 = vadd.f32 %v1628_v50, %v683_v61  ;;  %v704_v31 = vadd.f32 %v1628_v50, %v684_v37  ;;  %v488_v20 = vadd.f32 %v472_v40, %v439_v49 }
  0x45   : > { %v263_v21 = vmul.f32 %v1501_v26, %v1460_v4  ;;  %v489_v55 = vadd.f32 %v473_v43, %v440_v25  ;;  %v264_v56 = vmul.f32 %v1504_v27, %v1460_v4  ;;  %v312_v52 = vmul.f32 %v1507_v28, %v1462_v5 }
  0x46   : > { %v313_v57 = vmul.f32 %v1516_v33, %v1462_v5  ;;  %v719_v39 = vmax.f32 %v703_v45, 0.0  ;;  %v720_v23 = vmax.f32 %v704_v31, 0.0  ;;  %v537_v11 = vadd.f32 %v521_v24, %v488_v20 }
  0x47   : > { %v361_v61 = vmul.f32 %v1519_v34, %v1473_v8  ;;  %v538_v40 = vadd.f32 %v522_v3, %v489_v55  ;;  %v328_v37 = vadd.f32 %v312_v52, %v263_v21  ;;  %v362_v26 = vmul.f32 %v1522_v35, %v1473_v8 }
  0x48   : > { %v329_v49 = vadd.f32 %v313_v57, %v264_v56  ;;  %v731_v43 = vpack.c.bf16 %v720_v23, %v719_v39  ;;  %v589_v27 = vadd.f32 %v573_v62, %v537_v11  ;;  %v413_v28 = vmul.f32 %v1533_v41, %v1477_v9 }
  0x49   : > { %v414_v33 = vmul.f32 %v1536_v42, %v1477_v9  ;;  %v590_v45 = vadd.f32 %v574_v32, %v538_v40  ;;  %v377_v31 = vadd.f32 %v361_v61, %v328_v37  ;;  %v462_v34 = vmul.f32 %v1545_v47, %v1485_v14 }
  0x4a   : > { %v378_v24 = vadd.f32 %v362_v26, %v329_v49  ;;  %831 = vmatmul.bf16.vlgmr.msra.gmra.mxu2 %v731_v43  ;;  %v638_v3 = vadd.f32 %v622_v13, %v589_v27  ;;  %v463_v25 = vmul.f32 %v1548_v48, %v1485_v14  ;;  %v511_v35 = vmul.f32 %v1558_v53, %v1487_v15 }
  0x4b   : > { %v512_v41 = vmul.f32 %v1561_v54, %v1487_v15  ;;  %v639_v62 = vadd.f32 %v623_v10, %v590_v45  ;;  %v429_v11 = vadd.f32 %v413_v28, %v377_v31  ;;  %v563_v32 = vmul.f32 %v1570_v58, %v1495_v22 }
  0x4c   : > { %v430_v42 = vadd.f32 %v414_v33, %v378_v24  ;;  %v687_v20 = vadd.f32 %v671_v18, %v638_v3  ;;  %v564_v47 = vmul.f32 %v1579_v63, %v1495_v22  ;;  %v612_v13 = vmul.f32 %v1588_v6, %v1509_v29 }
  0x4d   : > { %v613_v48 = vmul.f32 %v1591_v7, %v1509_v29  ;;  %v688_v53 = vadd.f32 %v672_v46, %v639_v62  ;;  %v478_v21 = vadd.f32 %v462_v34, %v429_v11  ;;  %v661_v54 = vmul.f32 %v1599_v16, %v1524_v36  ;;  %v2105_v62 = vld [vmem:[#allocation6_spill] sm:$0xff] }
  0x4e   : > { %v479_v55 = vadd.f32 %v463_v25, %v430_v42  ;;  %v707_v10 = vadd.f32 %v1628_v50, %v687_v20  ;;  %v662_v18 = vmul.f32 %v1602_v17, %v1524_v36  ;;  %v267_v56 = vmul.f32 %v1570_v58, %v1460_v4  ;;  %v2106_v42 = vld [vmem:[#allocation7_spill] sm:$0xff] }
  0x4f   : > { %v268_v52 = vmul.f32 %v1579_v63, %v1460_v4  ;;  %v708_v57 = vadd.f32 %v1628_v50, %v688_v53  ;;  %v527_v39 = vadd.f32 %v511_v35, %v478_v21  ;;  %v316_v23 = vmul.f32 %v1588_v6, %v1462_v5  ;;  %v2109_v21 = vld [vmem:[#allocation10_spill] sm:$0xff] }
  0x50   : > { %v528_v46 = vadd.f32 %v512_v41, %v479_v55  ;;  %v723_v61 = vmax.f32 %v707_v10, 0.0  ;;  %v317_v40 = vmul.f32 %v1591_v7, %v1462_v5  ;;  %v365_v37 = vmul.f32 %v1599_v16, %v1473_v8 }
  0x51   : > { %v366_v58 = vmul.f32 %v1602_v17, %v1473_v8  ;;  %v724_v49 = vmax.f32 %v708_v57, 0.0  ;;  %v579_v26 = vadd.f32 %v563_v32, %v527_v39  ;;  %v332_v43 = vadd.f32 %v316_v23, %v267_v56  ;;  %v2107_v32 = vld [vmem:[#allocation8_spill] sm:$0xff] }
  0x52   : > { %v580_v63 = vadd.f32 %v564_v47, %v528_v46  ;;  %v333_v27 = vadd.f32 %v317_v40, %v268_v52  ;;  %v417_v28 = vmul.f32 %v1615_v38, %v1477_v9  ;;  %v418_v6 = vmul.f32 %v1621_v44, %v1477_v9 }
  0x53   : > { %v466_v7 = vmul.f32 %v1633_v59, %v1485_v14  ;;  %v733_v33 = vpack.c.bf16 %v724_v49, %v723_v61  ;;  %v628_v45 = vadd.f32 %v612_v13, %v579_v26  ;;  %v381_v31 = vadd.f32 %v365_v37, %v332_v43  ;;  %v2104_v59 = vld [vmem:[#allocation5_spill] sm:$0xff]  ;;  %v2110_v49 = vld [vmem:[#allocation11_spill] sm:$0xff] }
  0x54   : > { %v629_v16 = vadd.f32 %v613_v48, %v580_v63  ;;  %v382_v24 = vadd.f32 %v366_v58, %v333_v27  ;;  %v467_v17 = vmul.f32 %v1636_v60, %v1485_v14  ;;  %v515_v34 = vmul.f32 %v1643_v1, %v1487_v15  ;;  %v2108_v13 = vld [vmem:[#allocation9_spill] sm:$0xff]  ;;  %v2111_v27 = vld [vmem:[#allocation12_spill] sm:$0xff] }
  0x55   : > { %v516_v38 = vmul.f32 %v1646_v2, %v1487_v15  ;;  %841 = vmatmul.bf16.vlgmr.msra.gmra.mxu3 %v733_v33  ;;  %v677_v3 = vadd.f32 %v661_v54, %v628_v45  ;;  %v433_v25 = vadd.f32 %v417_v28, %v381_v31  ;;  %v567_v35 = vmul.f32 %v2104_v59, %v1495_v22 }
  0x56   : > { %v678_v44 = vadd.f32 %v662_v18, %v629_v16  ;;  %v434_v41 = vadd.f32 %v418_v6, %v382_v24  ;;  %v568_v11 = vmul.f32 %v2105_v62, %v1495_v22  ;;  %v616_v60 = vmul.f32 %v2106_v42, %v1509_v29  ;;  %v2112_v6 = vld [vmem:[#allocation13_spill] sm:$0xff]  ;;  %v2113_v16 = vld [vmem:[#allocation14_spill] sm:$0xff]  ;;  %v2114_v24 = vld [vmem:[#allocation15_spill] sm:$0xff] }
  0x57   : > { %v617_v1 = vmul.f32 %v2107_v32, %v1509_v29  ;;  %v697_v20 = vadd.f32 %v1628_v50, %v677_v3  ;;  %v482_v47 = vadd.f32 %v466_v7, %v433_v25  ;;  %v665_v48 = vmul.f32 %v2108_v13, %v1524_v36  ;;  %v2115_v3 = vld [vmem:[#allocation16_spill] sm:$0xff]  ;;  %v2116_v25 = vld [vmem:[#allocation17_spill] sm:$0xff] }
  0x58   : > { %v698_v2 = vadd.f32 %v1628_v50, %v678_v44  ;;  %v483_v53 = vadd.f32 %v467_v17, %v434_v41  ;;  %v666_v55 = vmul.f32 %v2109_v21, %v1524_v36  ;;  %v271_v54 = vmul.f32 %v2104_v59, %v1460_v4 }
  0x59   : > { %v272_v10 = vmul.f32 %v2105_v62, %v1460_v4  ;;  %v713_v18 = vmax.f32 %v697_v20, 0.0  ;;  %v531_v52 = vadd.f32 %v515_v34, %v482_v47  ;;  %v320_v57 = vmul.f32 %v2106_v42, %v1462_v5  ;;  %v2118_v20 = vld [vmem:[#allocation19_spill] sm:$0xff] }
  0x5a   : > { %v714_v56 = vmax.f32 %v698_v2, 0.0  ;;  %v532_v39 = vadd.f32 %v516_v38, %v483_v53  ;;  %v321_v46 = vmul.f32 %v2107_v32, %v1462_v5  ;;  %v369_v23 = vmul.f32 %v2108_v13, %v1473_v8  ;;  %v2119_v2 = vld [vmem:[#allocation20_spill] sm:$0xff] }
  0x5b   : > { %v370_v61 = vmul.f32 %v2109_v21, %v1473_v8  ;;  %v583_v37 = vadd.f32 %v567_v35, %v531_v52  ;;  %v336_v58 = vadd.f32 %v320_v57, %v271_v54  ;;  %v421_v26 = vmul.f32 %v2110_v49, %v1477_v9  ;;  %v2121_v49 = vld [vmem:[#allocation22_spill] sm:$0xff] }
  0x5c   : > { %v728_v40 = vpack.c.bf16 %v714_v56, %v713_v18  ;;  %v584_v63 = vadd.f32 %v568_v11, %v532_v39  ;;  %v337_v43 = vadd.f32 %v321_v46, %v272_v10  ;;  %v422_v28 = vmul.f32 %v2111_v27, %v1477_v9  ;;  %v2117_v11 = vld [vmem:[#allocation18_spill] sm:$0xff] }
  0x5d   : > { %v470_v7 = vmul.f32 %v2112_v6, %v1485_v14  ;;  %v632_v33 = vadd.f32 %v616_v60, %v583_v37  ;;  %v385_v45 = vadd.f32 %v369_v23, %v336_v58  ;;  %v471_v31 = vmul.f32 %v2113_v16, %v1485_v14 }
  0x5e   : > { %816 = vmatmul.bf16.gmra.mxu0 %v728_v40  ;;  %v519_v17 = vmul.f32 %v2114_v24, %v1487_v15  ;;  %v633_v34 = vadd.f32 %v617_v1, %v584_v63  ;;  %v386_v38 = vadd.f32 %v370_v61, %v337_v43  ;;  %v520_v44 = vmul.f32 %v2115_v3, %v1487_v15 }
  0x5f   : > { %v571_v59 = vmul.f32 %v2116_v25, %v1495_v22  ;;  %v681_v35 = vadd.f32 %v665_v48, %v632_v33  ;;  %v437_v41 = vadd.f32 %v421_v26, %v385_v45  ;;  %v572_v62 = vmul.f32 %v1742_v0, %v1495_v22  ;;  %v1065_v45 = vld [vmem:[%s1475_s26 + $0xe0] sm:$0xff] }
  0x60   : > { %v620_v42 = vmul.f32 %v2117_v11, %v1509_v29  ;;  %v682_v60 = vadd.f32 %v666_v55, %v633_v34  ;;  %v438_v32 = vadd.f32 %v422_v28, %v386_v38  ;;  %v621_v1 = vmul.f32 %v2118_v20, %v1509_v29 }
  0x61   : > { %v669_v47 = vmul.f32 %v2119_v2, %v1524_v36  ;;  %v701_v13 = vadd.f32 %v1628_v50, %v681_v35  ;;  %v486_v53 = vadd.f32 %v470_v7, %v437_v41  ;;  %v670_v48 = vmul.f32 %v1762_v19, %v1524_v36 }
  0x62   : > { %v275_v21 = vmul.f32 %v2116_v25, %v1460_v4  ;;  %v702_v54 = vadd.f32 %v1628_v50, %v682_v60  ;;  %v487_v10 = vadd.f32 %v471_v31, %v438_v32  ;;  %v276_v55 = vmul.f32 %v1742_v0, %v1460_v4  ;;  %v2120_v0 = vld [vmem:[#allocation21_spill] sm:$0xff] }
  0x63   : > { %v324_v18 = vmul.f32 %v2117_v11, %v1462_v5  ;;  %v717_v56 = vmax.f32 %v701_v13, 0.0  ;;  %v535_v52 = vadd.f32 %v519_v17, %v486_v53  ;;  %v325_v57 = vmul.f32 %v2118_v20, %v1462_v5  ;;  %v1080_v17 = vld [vmem:[%s1475_s26 + $0xd9] sm:$0xff] }
  0x64   : > { %v373_v39 = vmul.f32 %v2119_v2, %v1473_v8  ;;  %v718_v46 = vmax.f32 %v702_v54, 0.0  ;;  %v536_v23 = vadd.f32 %v520_v44, %v487_v10  ;;  %v374_v40 = vmul.f32 %v1762_v19, %v1473_v8  ;;  %v1064_v19 = vld [vmem:[%s1475_s26 + $0xd8] sm:$0xff] }
  0x65   : > { %v340_v61 = vadd.f32 %v324_v18, %v275_v21  ;;  %v587_v37 = vadd.f32 %v571_v59, %v535_v52  ;;  %v341_v4 = vadd.f32 %v325_v57, %v276_v55  ;;  %v425_v58 = vmul.f32 %v2120_v0, %v1477_v9  ;;  %v1096_v59 = vld [vmem:[%s1475_s26 + $0xda] sm:$0xff] }
  0x66   : > { %v426_v26 = vmul.f32 %v2121_v49, %v1477_v9  ;;  %v730_v5 = vpack.c.bf16 %v718_v46, %v717_v56  ;;  %v588_v63 = vadd.f32 %v572_v62, %v536_v23  ;;  %v474_v27 = vmul.f32 %v1777_v51, %v1485_v14  ;;  %v2122_v51 = vld [vmem:[#allocation23_spill] sm:$0xff]  ;;  %v1097_v62 = vld [vmem:[%s1475_s26 + $0xe2] sm:$0xff]  ;;  %v1964_v18 = vld [vmem:[%s2052_s4] ss:$0 sm:$0xff] }
  0x67   : > { %v389_v43 = vadd.f32 %v373_v39, %v340_v61  ;;  %v636_v28 = vadd.f32 %v620_v42, %v587_v37  ;;  %v390_v6 = vadd.f32 %v374_v40, %v341_v4  ;;  %v475_v8 = vmul.f32 %v1782_v30, %v1485_v14  ;;  %v1081_v30 = vld [vmem:[%s1475_s26 + $0xe1] sm:$0xff]  ;;  %s229_s26 = sand.u32 1, %s1316_s19  }
  0x68   : > { %826 = vmatmul.bf16.gmra.mxu1 %v730_v5  ;;  %v637_v7 = vadd.f32 %v621_v1, %v588_v63  ;;  %v523_v9 = vmul.f32 %v1785_v12, %v1487_v15  ;;  %v524_v24 = vmul.f32 %v2122_v51, %v1487_v15  ;;  %v575_v14 = vmul.f32 %v1064_v19, %v1495_v22  ;;  %s994_s9 = sshll.u32 %s229_s26, 7  ;;  %s885_s30 = scalar_lea.sflag [#allocation3], %s229_s26 }
  0x69   : > { %v441_v33 = vadd.f32 %v425_v58, %v389_v43  ;;  %v685_v16 = vadd.f32 %v669_v47, %v636_v28  ;;  %v442_v31 = vadd.f32 %v426_v26, %v390_v6  ;;  %v576_v25 = vmul.f32 %v1065_v45, %v1495_v22  ;;  %s1969_s10 = scalar_lea.vmem [#allocation2], %s994_s9  ;;  %s1262_s9 = scalar_lea.hbm %s1261_s27, 128 }
  0x6a   : > { %v686_v34 = vadd.f32 %v670_v48, %v637_v7  ;;  %v624_v41 = vmul.f32 %v1080_v17, %v1509_v29  ;;  %v625_v42 = vmul.f32 %v1081_v30, %v1509_v29  ;;  %v673_v20 = vmul.f32 %v1096_v59, %v1524_v36  ;;  %s900_s22 = sshll.u32 %s1969_s10, 4  ;;  %p1263_p13 = scmp.ne.s32.totalorder %s1261_s27, %s1262_s9  ;;  %s901_s22 = int_to_ptr.vmem [resolvable:$true] %s900_s22 }
  0x6b   : > { %v490_v38 = vadd.f32 %v474_v27, %v441_v33  ;;  %v705_v3 = vadd.f32 %v1628_v50, %v685_v16  ;;  %v491_v44 = vadd.f32 %v475_v8, %v442_v31  ;;  %v674_v22 = vmul.f32 %v1097_v62, %v1524_v36  ;;  %p1268_p4 = scmp.lt.s32.totalorder %s1266_s14, %s1262_s9 }
  0x6c   : > { %v706_v12 = vadd.f32 %v1628_v50, %v686_v34  ;;  %p1264_p0 = pnand %p1263_p13, %p1425_p3 }
  0x6d   : > { %v539_v35 = vadd.f32 %v523_v9, %v490_v38  ;;  %v721_v11 = vmax.f32 %v705_v3, 0.0  ;;  %v540_v15 = vadd.f32 %v524_v24, %v491_v44  ;;  %p1269_p5 = por %p1268_p4, %p1267_p2 }
  0x6e   : > { %v722_v60 = vmax.f32 %v706_v12, 0.0  ;;  %p1265_p1 = pneg %p1264_p0 }
  0x6f   : > { %v591_v32 = vadd.f32 %v575_v14, %v539_v35  ;;  %v592_v1 = vadd.f32 %v576_v25, %v540_v15 }
  0x70   : > { %v732_v2 = vpack.c.bf16 %v722_v60, %v721_v11  ;;  %p1270_p6 = pnand %p1269_p5, %p1265_p1 }
  0x71   : > { %v640_v47 = vadd.f32 %v624_v41, %v591_v32  ;;  %v641_v13 = vadd.f32 %v625_v42, %v592_v1 }
  0x72   : > { %836 = vmatmul.bf16.gmra.mxu2 %v732_v2 }
  0x73   : > { %v689_v53 = vadd.f32 %v673_v20, %v640_v47  ;;  %v690_v48 = vadd.f32 %v674_v22, %v641_v13 }
  0x75   : > { %v709_v21 = vadd.f32 %v1628_v50, %v689_v53  ;;  %v710_v54 = vadd.f32 %v1628_v50, %v690_v48 }
  0x77   : > { %v725_v29 = vmax.f32 %v709_v21, 0.0  ;;  %v726_v10 = vmax.f32 %v710_v54, 0.0 }
  0x79   : > { %v734_v55 = vpack.c.bf16 %v726_v10, %v725_v29 }
  0x7b   : > { %846 = vmatmul.bf16.gmra.mxu3 %v734_v55 }
  0xb5   : > { %v812_v36 = vpop.f32.mrf.mxu0 }
  0xb6   : > { %v813_v56 = vadd.f32 %v1964_v18, %v812_v36 }
  0xb8   : > { %v852_v52 = vmax.f32 %v813_v56, 0.0 }
  0xba   : > { %868 = vst [vmem:[%s1969_s10] sm:$0xff] %v852_v52 }
  0xbc   : > { %v822_v50 = vpop.f32.mrf.mxu1 }
  0xbd   : > { %v823_v57 = vadd.f32 %v1964_v18, %v822_v50  ;;  %v814_v39 = vpop.f32.mrf.mxu0 }
  0xbe   : > { %v815_v46 = vadd.f32 %v1964_v18, %v814_v39 }
  0xbf   : > { %v856_v23 = vmax.f32 %v823_v57, 0.0 }
  0xc0   : > { %v853_v61 = vmax.f32 %v815_v46, 0.0 }
  0xc1   : > { %872 = vst [vmem:[%s1969_s10 + $0x20] sm:$0xff] %v856_v23 }
  0xc2   : > { %869 = vst [vmem:[%s1969_s10 + $0x8] sm:$0xff] %v853_v61 }
  0xc4   : > { %v824_v40 = vpop.f32.mrf.mxu1 }
  0xc5   : > { %v825_v37 = vadd.f32 %v1964_v18, %v824_v40 }
  0xc7   : > { %v857_v4 = vmax.f32 %v825_v37, 0.0 }
  0xc9   : > { %873 = vst [vmem:[%s1969_s10 + $0x28] sm:$0xff] %v857_v4 }
  0xcd   : > { %v832_v0 = vpop.f32.mrf.mxu2 }
  0xce   : > { %v833_v58 = vadd.f32 %v1964_v18, %v832_v0 }
  0xd0   : > { %v860_v49 = vmax.f32 %v833_v58, 0.0 }
  0xd2   : > { %876 = vst [vmem:[%s1969_s10 + $0x40] sm:$0xff] %v860_v49 }
  0xd5   : > { %v834_v26 = vpop.f32.mrf.mxu2 }
  0xd6   : > { %v835_v5 = vadd.f32 %v1964_v18, %v834_v26 }
  0xd8   : > { %v842_v63 = vpop.f32.mrf.mxu3  ;;  %v861_v43 = vmax.f32 %v835_v5, 0.0 }
  0xd9   : > { %v843_v27 = vadd.f32 %v1964_v18, %v842_v63 }
  0xda   : > { %877 = vst [vmem:[%s1969_s10 + $0x48] sm:$0xff] %v861_v43 }
  0xdb   : > { %v817_v28 = vpop.f32.mrf.mxu0  ;;  %v864_v6 = vmax.f32 %v843_v27, 0.0 }
  0xdc   : > { %v818_v8 = vadd.f32 %v1964_v18, %v817_v28 }
  0xdd   : > { %880 = vst [vmem:[%s1969_s10 + $0x60] sm:$0xff] %v864_v6 }
  0xde   : > { %v854_v19 = vmax.f32 %v818_v8, 0.0 }
  0xe0   : > { %870 = vst [vmem:[%s1969_s10 + $0x10] sm:$0xff] %v854_v19  ;;  %v844_v7 = vpop.f32.mrf.mxu3 }
  0xe1   : > { %v845_v33 = vadd.f32 %v1964_v18, %v844_v7 }
  0xe3   : > { %v819_v9 = vpop.f32.mrf.mxu0  ;;  %v865_v45 = vmax.f32 %v845_v33, 0.0 }
  0xe4   : > { %v820_v16 = vadd.f32 %v1964_v18, %v819_v9 }
  0xe5   : > { %881 = vst [vmem:[%s1969_s10 + $0x68] sm:$0xff] %v865_v45  ;;  %v827_v31 = vpop.f32.mrf.mxu1 }
  0xe6   : > { %v855_v51 = vmax.f32 %v820_v16, 0.0  ;;  %v828_v24 = vadd.f32 %v1964_v18, %v827_v31 }
  0xe8   : > { %871 = vst [vmem:[%s1969_s10 + $0x18] sm:$0xff] %v855_v51  ;;  %v858_v17 = vmax.f32 %v828_v24, 0.0 }
  0xea   : > { %874 = vst [vmem:[%s1969_s10 + $0x30] sm:$0xff] %v858_v17 }
  0xed   : > { %v829_v34 = vpop.f32.mrf.mxu1 }
  0xee   : > { %v830_v38 = vadd.f32 %v1964_v18, %v829_v34 }
  0xf0   : > { %v859_v14 = vmax.f32 %v830_v38, 0.0 }
  0xf2   : > { %875 = vst [vmem:[%s1969_s10 + $0x38] sm:$0xff] %v859_v14 }
  0xf5   : > { %v837_v30 = vpop.f32.mrf.mxu2 }
  0xf6   : > { %v838_v3 = vadd.f32 %v1964_v18, %v837_v30 }
  0xf8   : > { %v862_v44 = vmax.f32 %v838_v3, 0.0 }
  0xfa   : > { %878 = vst [vmem:[%s1969_s10 + $0x50] sm:$0xff] %v862_v44 }
  0xfd   : > { %v839_v25 = vpop.f32.mrf.mxu2 }
  0xfe   : > { %v847_v59 = vpop.f32.mrf.mxu3  ;;  %v840_v12 = vadd.f32 %v1964_v18, %v839_v25 }
  0xff   : > { %v848_v35 = vadd.f32 %v1964_v18, %v847_v59 }
 0x100   : > { %v863_v41 = vmax.f32 %v840_v12, 0.0 }
 0x101   : > { %v866_v62 = vmax.f32 %v848_v35, 0.0 }
 0x102   : > { %879 = vst [vmem:[%s1969_s10 + $0x58] sm:$0xff] %v863_v41 }
 0x103   : > { %882 = vst [vmem:[%s1969_s10 + $0x70] sm:$0xff] %v866_v62 }
 0x106   : > { %v849_v11 = vpop.f32.mrf.mxu3 }
 0x107   : > { %v850_v15 = vadd.f32 %v1964_v18, %v849_v11 }
 0x109   : > { %v867_v42 = vmax.f32 %v850_v15, 0.0 }
 0x10b   : > { %883 = vst [vmem:[%s1969_s10 + $0x78] sm:$0xff] %v867_v42 }
 0x10c   : > { %1273 = shalt.err (!%p1270_p6)
}
 0x10d   : > { %s1342_s26 = smov 128   ;;  %s1343_s10 = smov 8  }
 0x10e   : > { %1171 = dma.vmem_to_hbm [thread:$0]  (%p1425_p3), %s901_s22, 2048, %s903_s8, %s885_s30, %s1342_s26, %s1342_s26, %s1343_s10  }
 0x10f PF: > { %p1177_p7 = scmp.ge.s32.totalorder %s1340_s25, 2  ;;  %s917_s16 = sand.u32 1, %s1312_s18  }
 0x110   : > { %s918_s21 = scalar_lea.sflag [#allocation3], %s917_s16 }
 0x111   : > { %p1174_p9 = pnand %p1177_p7, %p1434_p8 }
 0x113   : > { %p1175_p10 = pneg %p1174_p9 }
 0x115   : > { %1307 = dma.done.wait (%p1175_p10), %s918_s21, 2048  }
 0x116   : > { %1309 = vsyncadd (%p1175_p10), %s918_s21, 4294965248  ;;  %s18_s25 = sadd.s32 1, %s1340_s25   ;;  %s2123_s18 = smov %s1316_s19 }
 0x117   : > { %p15_p11 = scmp.ge.s32.totalorder %s18_s25, 6   ;;  %s2124_s19 = smov %s1320_s20 }
 0x118   : > { %s2125_s20 = smov %s1443_s11  ;;  %s2126_s21 = smov %s1332_s23 }
 0x119   : > { %s2127_s22 = smov %s1336_s24  ;;  %s2128_s23 = smov %s2131_s28 }
 0x11a   : > { %s2129_s24 = smov %s2135_s29  ;;  %17 = sbr.rel (!%p15_p11) target bundleno = 5 (0x5), region = 78 }
 0x11f   :  { %924 = vsyncpa [#allocation3], 1 }
 0x120   :  { %926 = vsyncpa [#allocation3 + $0x1], 1 }

</bundles_post_ra>
